<compile_context>
chip_gen: v5e
topology: v5e:2x2
jax: 0.10.0
libtpu: 0.0.40
codegen_flags: <defaults>
</compile_context>

<pallas_src>
import math
import functools

import jax
import jax.numpy as jnp
from jax.experimental import pallas as pl
from jax.experimental.pallas import tpu as pltpu

# D_4 group permutations (rows of the index map from the PyTorch module).
_D4_PERMS = jnp.array(
    [
        [0, 1, 2, 3, 4, 5, 6, 7],
        [3, 0, 1, 2, 5, 6, 7, 4],
        [2, 3, 0, 1, 6, 7, 4, 5],
        [1, 2, 3, 0, 7, 4, 5, 6],
        [4, 5, 6, 7, 0, 1, 2, 3],
        [5, 6, 7, 4, 3, 0, 1, 2],
        [6, 7, 4, 5, 2, 3, 0, 1],
        [7, 4, 5, 6, 1, 2, 3, 0],
    ],
    dtype=jnp.int32,
)


def expand_d4_weight(base_weight):
    """base_weight: (O, I, 8) -> full weight matrix (O*8, I*8).  Cheap JAX glue."""
    O, I, _ = base_weight.shape
    gathered = base_weight[:, :, _D4_PERMS]            # (O, I, 8, 8)
    w_full = jnp.transpose(gathered, (0, 2, 1, 3))     # (O, 8, I, 8)
    return w_full.reshape(O * 8, I * 8)                # (O*8, I*8)


def _d4_matmul_kernel(w_ref, x_ref, o_ref):
    # w_ref: (Co, C) resident weight; x_ref: (bN, C, t_hw); o_ref: (bN, Co, t_hw).
    # Contraction over channels; lane axis = H*W tile -> unmasked full-lane vst.
    w = w_ref[...]
    for b in range(x_ref.shape[0]):        # bN is small & static: unrolled
        o_ref[b] = jnp.dot(
            w, x_ref[b], preferred_element_type=jnp.float32
        ).astype(o_ref.dtype)


def _vmem_capacity_bytes():
    try:
        cap = int(pltpu.get_tpu_info().vmem_capacity_bytes)
    except Exception:
        cap = 64 * 1024 * 1024     # conservative fallback (v7x per-core VMEM)
    return max(cap, 32 * 1024 * 1024)


def _choose_tiles(N, C, Co, HW, itemsize):
    """Pick (batch_block, hw_tile) under a per-generation VMEM budget."""
    vmem_cap = _vmem_capacity_bytes()
    # Quarter of physical VMEM, clamped: ~24 MiB on v5e/v6e (128 MiB physical),
    # 16 MiB on v7x (64 MiB physical).  vmem_limit_bytes is raised to match.
    budget = min(max(vmem_cap // 4, 8 << 20), 24 << 20)
    weight_bytes = 2 * Co * C * itemsize               # budget as double-buffered
    act_budget = max(budget - weight_bytes, 2 << 20)
    per_col_bytes = 2 * (C + Co) * itemsize            # dbl-buffered x + out column
    max_cols = max(128, act_budget // per_col_bytes)   # total bN * t_hw columns

    # Lane-axis tile: full H*W when it fits (always a legal block shape),
    # otherwise the largest multiple of 128 that fits the budget.
    if HW <= max_cols:
        t_hw = HW
    else:
        t_hw = max(128, (max_cols // 128) * 128)
    hw_tiles = pl.cdiv(HW, t_hw)

    # N == 1 with a single H*W tile would leave one v7x TensorCore idle: split.
    if N == 1 and hw_tiles == 1 and HW > 128:
        t_hw = (((HW + 1) // 2) + 127) // 128 * 128
        hw_tiles = pl.cdiv(HW, t_hw)

    # Fold batch images into one block to amortize the ~0.35 us/step overhead,
    # but keep >=2 total grid steps so both v7x cores / the pipeline have work.
    bn = int(min(N, max(1, max_cols // t_hw)))
    if bn > 1 and pl.cdiv(N, bn) * hw_tiles < 2:
        bn = int(pl.cdiv(N, 2))
    return bn, t_hw


def _pallas_d4_matmul(w_full, x3):
    """w_full: (Co, C), x3: (N, C, HW) -> (N, Co, HW) in x3.dtype."""
    Co, C = w_full.shape
    N, _, HW = x3.shape
    itemsize = x3.dtype.itemsize
    bn, t_hw = _choose_tiles(N, C, Co, HW, itemsize)
    grid = (pl.cdiv(N, bn), pl.cdiv(HW, t_hw))

    # Explicit VMEM limit: actual double-buffered working set + headroom,
    # never below the common 32 MiB scoped default, never near physical.
    buf_bytes = 2 * (Co * C + bn * t_hw * (C + Co)) * itemsize
    vmem_limit = int(
        min(
            _vmem_capacity_bytes() - (8 << 20),
            max(buf_bytes + (buf_bytes >> 2) + (2 << 20), 32 << 20),
        )
    )

    cost = pl.CostEstimate(
        flops=2 * N * HW * C * Co,
        transcendentals=0,
        bytes_accessed=(N * C * HW + Co * C + N * Co * HW) * itemsize,
    )

    return pl.pallas_call(
        _d4_matmul_kernel,
        out_shape=jax.ShapeDtypeStruct((N, Co, HW), x3.dtype),
        grid_spec=pltpu.PrefetchScalarGridSpec(
            num_scalar_prefetch=0,
            grid=grid,
            in_specs=[
                # Small weight: one full-extent block with a constant block
                # index -> kept resident by the pipeline, no per-step re-fetch.
                pl.BlockSpec((Co, C), lambda n, j: (0, 0)),
                # Activations in native NCHW-flattened layout.
                pl.BlockSpec((bn, C, t_hw), lambda n, j: (n, 0, j)),
            ],
            out_specs=pl.BlockSpec((bn, Co, t_hw), lambda n, j: (n, 0, j)),
        ),
        compiler_params=pltpu.CompilerParams(
            dimension_semantics=("parallel", "parallel"),
            vmem_limit_bytes=vmem_limit,
        ),
        cost_estimate=cost,
    )(w_full, x3)


@functools.partial(jax.jit, static_argnums=(2, 3))
def d4_1x1_forward(x, base_weight, stride=1, compute_dtype=None):
    """x: (N, in_channels*8, H, W) NCHW; base_weight: (O, I, 8).

    compute_dtype: optional dtype for the DMA/compute path (e.g. jnp.bfloat16
    halves HBM traffic on this memory-bound op); accumulation stays f32.
    """
    N, C, H, W = x.shape
    dtype = jnp.dtype(compute_dtype) if compute_dtype is not None else x.dtype
    x = x.astype(dtype)
    w_full = expand_d4_weight(base_weight).astype(dtype)    # (O*8, I*8)
    Co = w_full.shape[0]

    x3 = x.reshape(N, C, H * W)            # view-like; no transpose, no cast
    y3 = _pallas_d4_matmul(w_full, x3)     # (N, Co, H*W)
    y = y3.reshape(N, Co, H, W)

    if stride != 1:
        # The PyTorch module applies nn.MaxPool2d(2, 2) after the 1x1 conv.
        # TODO(synk): fuse the 2x2 max-pool into the Pallas epilogue (pool in
        # VMEM before the store) to avoid writing + re-reading the full-res
        # activation in HBM on this path.
        y = jax.lax.reduce_window(
            y,
            jnp.array(-jnp.inf, dtype=y.dtype),
            jax.lax.max,
            window_dimensions=(1, 1, 2, 2),
            window_strides=(1, 1, 2, 2),
            padding="VALID",
        )
    return y


class D4_1x1:
    """JAX/Pallas port of the PyTorch D_4_1x1 module (forward pass)."""

    def __init__(self, in_channels, out_channels, stride=1, key=None):
        self.in_channels = in_channels
        self.out_channels = out_channels
        self.stride = stride
        if key is None:
            key = jax.random.PRNGKey(0)
        # torch.randn(out, in, 8) / sqrt(8*in/2), deterministic via JAX PRNG.
        self.weight = (
            jax.random.normal(key, (out_channels, in_channels, 8), jnp.float32)
            / math.sqrt(8 * in_channels / 2)
        )

    def __call__(self, x, compute_dtype=None):
        assert x.shape[1] == self.in_channels * 8
        return d4_1x1_forward(x, self.weight, self.stride, compute_dtype)


def _reference_forward(x, base_weight, stride):
    """Pure-JAX reference matching the PyTorch semantics."""
    w_full = expand_d4_weight(base_weight).astype(x.dtype)    # (O*8, I*8)
    y = jnp.einsum("nchw,oc->nohw", x, w_full)
    if stride != 1:
        y = jax.lax.reduce_window(
            y, jnp.array(-jnp.inf, dtype=y.dtype), jax.lax.max,
            (1, 1, 2, 2), (1, 1, 2, 2), "VALID"
        )
    return y


if __name__ == "__main__":
    key = jax.random.PRNGKey(0)
    k_w, k_x = jax.random.split(key)

    in_channels = 4
    out_channels = 4
    batch = 2
    spatial = 16

    # Input: (N, in_channels*8, H, W) — NCHW, matching the PyTorch module.
    x = jax.random.normal(
        k_x, (batch, in_channels * 8, spatial, spatial), jnp.float32
    )

    # stride=1: pure 1x1 group conv.
    mod = D4_1x1(in_channels, out_channels, stride=1, key=k_w)
    y = mod(x)
    jax.block_until_ready(y)
    y_ref = _reference_forward(x, mod.weight, 1)
    assert y.shape == (batch, out_channels * 8, spatial, spatial), y.shape
    assert jnp.allclose(y, y_ref, atol=1e-4, rtol=1e-4), float(
        jnp.max(jnp.abs(y - y_ref))
    )

    # stride=2: 1x1 conv followed by the module's MaxPool2d(2, 2).
    mod2 = D4_1x1(in_channels, out_channels, stride=2, key=k_w)
    y2 = mod2(x)
    jax.block_until_ready(y2)
    y2_ref = _reference_forward(x, mod2.weight, 2)
    assert y2.shape == (batch, out_channels * 8, spatial // 2, spatial // 2)
    assert jnp.allclose(y2, y2_ref, atol=1e-4, rtol=1e-4), float(
        jnp.max(jnp.abs(y2 - y2_ref))
    )

    # bf16 DMA-path knob (halves HBM bytes on this memory-bound op).
    y_bf = mod(x, compute_dtype=jnp.bfloat16)
    jax.block_until_ready(y_bf)
    y_bf_ref = _reference_forward(x.astype(jnp.bfloat16), mod.weight, 1)
    assert jnp.allclose(
        y_bf.astype(jnp.float32), y_bf_ref.astype(jnp.float32),
        atol=1e-1, rtol=1e-1,
    ), float(
        jnp.max(jnp.abs(y_bf.astype(jnp.float32) - y_bf_ref.astype(jnp.float32)))
    )

    print("KERNEL_OK")
</pallas_src>

<mosaic_0001>
module attributes {stable_mosaic.version = 11 : i64} {
  func.func @_d4_matmul_kernel(%arg0: i32, %arg1: i32, %arg2: memref<32x32xf32, #tpu.memory_space<vmem>>, %arg3: memref<1x32x256xf32, #tpu.memory_space<vmem>>, %arg4: memref<1x32x256xf32, #tpu.memory_space<vmem>>) attributes {dimension_semantics = [#tpu.dimension_semantics<parallel>, #tpu.dimension_semantics<parallel>], iteration_bounds = array<i64: 2, 1>, scalar_prefetch = 0 : i64, scratch_operands = 0 : i64, tpu.core_type = #tpu.core_type<tc>, window_params = [{pipeline_mode = #tpu.pipeline_mode<synchronous>, transform_indices = @transform_0, window_bounds = array<i64: 32, 32>}, {transform_indices = @transform_1, window_bounds = array<i64: 1, 32, 256>}, {transform_indices = @transform_2, window_bounds = array<i64: 1, 32, 256>}]} {
    %c0 = arith.constant 0 : index
    %c0_0 = arith.constant 0 : index
    %0 = vector.load %arg2[%c0, %c0_0] : memref<32x32xf32, #tpu.memory_space<vmem>>, vector<32x32xf32>
    %c0_1 = arith.constant 0 : index
    %c0_2 = arith.constant 0 : index
    %c0_3 = arith.constant 0 : index
    %1 = vector.load %arg3[%c0_1, %c0_2, %c0_3] : memref<1x32x256xf32, #tpu.memory_space<vmem>>, vector<1x32x256xf32>
    %2 = vector.shape_cast %1 : vector<1x32x256xf32> to vector<32x256xf32>
    %cst = arith.constant dense<0.000000e+00> : vector<32x256xf32>
    %3 = tpu.matmul %0, %2, %cst {dimension_numbers = #tpu.dot_dimension_numbers<[1], [0], [0], [1], [0, 0, 1, 1], [], []>} : vector<32x32xf32>, vector<32x256xf32>, vector<32x256xf32> -> vector<32x256xf32>
    %c0_4 = arith.constant 0 : index
    %c0_5 = arith.constant 0 : index
    %c0_6 = arith.constant 0 : index
    %4 = vector.load %arg4[%c0_4, %c0_5, %c0_6] : memref<1x32x256xf32, #tpu.memory_space<vmem>>, vector<1x32x256xf32>
    %5 = vector.shape_cast %4 : vector<1x32x256xf32> to vector<32x256xf32>
    %6 = vector.shape_cast %3 : vector<32x256xf32> to vector<1x32x256xf32>
    tpu.vector_store %arg4[%c0_4, %c0_5, %c0_6], %6 {strides = array<i32>} : memref<1x32x256xf32, #tpu.memory_space<vmem>>, vector<1x32x256xf32>,
    return
  }
  func.func @transform_0(%arg0: i32, %arg1: i32) -> (i32, i32) {
    %c0_i32 = arith.constant 0 : i32
    %c0_i32_0 = arith.constant 0 : i32
    %c0_i32_1 = arith.constant 0 : i32
    return %c0_i32, %c0_i32_0 : i32, i32
  }
  func.func @transform_1(%arg0: i32, %arg1: i32) -> (i32, i32, i32) {
    %c0_i32 = arith.constant 0 : i32
    %c0_i32_0 = arith.constant 0 : i32
    return %arg0, %c0_i32, %arg1 : i32, i32, i32
  }
  func.func @transform_2(%arg0: i32, %arg1: i32) -> (i32, i32, i32) {
    %c0_i32 = arith.constant 0 : i32
    %c0_i32_0 = arith.constant 0 : i32
    return %arg0, %c0_i32, %arg1 : i32, i32, i32
  }
}

</mosaic_0001>

<bundles_post_ra>
// kernel: d4_1x1_forward.1
= control target key start
LH: loop header
LB: loop body
LE: loop exit
PB: predicated region body
PF: predicated region fallthrough
CT: control target
= control target key end

     0   :  { %s453_s9 = smov 0   ;;  %s455_s10 = smov 0   ;;  %s513_s0 = inlined_call_operand.vmem [shape: f32[32,32], index: 0, kind: input, shape index: {}]   ;;  %s514_s1 = inlined_call_operand.vmem [shape: f32[2,32,256], index: 1, kind: input, shape index: {}]   ;;  %s515_s2 = inlined_call_operand.vmem [shape: f32[2,32,256], index: 2, kind: output, shape index: {}]  }
   0x1   :  { %s457_s11 = smov 0  }
   0x2 LB: > { %s24_s12 = sadd.s32 1, %s432_s10  ;;  %p365_p0 = scmp.ge.s32.totalorder %s436_s11, 1  ;;  %s436_s11 = sphi %s457_s11, %s12_s11   ;;  %s432_s10 = sphi %s455_s10, %s517_s10   ;;  %s428_s9 = sphi %s453_s9, %s516_s9  }
   0x3   : > { %p26_p1 = scmp.ge.s32.totalorder %s24_s12, 2  ;;  %p133_p2 = scmp.lt.s32.totalorder %s436_s11, 3 }
   0x5   : > { %s519_s12 = smov (%p26_p1, %s24_s12), 0  ;;  %p134_p3 = pnand %p365_p0, %p133_p2 }
   0x6   : > { %p164_p4 = scmp.lt.s32.totalorder (!%p134_p3), %s428_s9, 1 }
   0x7   : > { %137 = sbr.rel (%p134_p3) target bundleno = 165 (0xa5), region = 28 }
   0xc   : > { %s521_s9 = smov (!%p164_p4, %s428_s9), 1  ;;  %v185_v8 = vld [vmem:[%s513_s0 + $0x10] sm:$0xff]  ;;  %vm195_vm0 = vcmask 261120   ;;  %v183_v9 = vld [vmem:[%s513_s0] sm:$0xff]  ;;  %v186_v10 = vld [vmem:[%s513_s0 + $0x18] sm:$0xff] }
   0xd   : > { %s380_s13 = sshll.u32 %s521_s9, 6  ;;  %v184_v11 = vld [vmem:[%s513_s0 + $0x8] sm:$0xff] }
   0xe   : > { %s171_s16 = scalar_lea.vmem %s514_s1, %s380_s13  ;;  %s181_s27 = scalar_lea.vmem %s515_s2, %s380_s13 }
   0xf   : > { %v193_v0 = vld [vmem:[%s171_s16 + $0x30] sm:$0xff]  ;;  %v194_v1 = vld [vmem:[%s171_s16 + $0x38] sm:$0xff]  ;;  %v191_v2 = vld [vmem:[%s171_s16 + $0x20] sm:$0xff] }
  0x10   : > { %382 = vmatpush.msra.mxu2 %v193_v0  ;;  %386 = vmatpush.msra.mxu3 %v194_v1  ;;  %v192_v3 = vld [vmem:[%s171_s16 + $0x28] sm:$0xff]  ;;  %v189_v4 = vld [vmem:[%s171_s16 + $0x10] sm:$0xff]  ;;  %v190_v5 = vld [vmem:[%s171_s16 + $0x18] sm:$0xff] }
  0x11   : > { %220 = vmatpush.msra.mxu0 %v193_v0  ;;  %249 = vmatpush.msra.mxu1 %v194_v1  ;;  %v187_v6 = vld [vmem:[%s171_s16] sm:$0xff]  ;;  %v188_v7 = vld [vmem:[%s171_s16 + $0x8] sm:$0xff] }
  0x12   : > { %383 = vmatpush.msra.mxu2 %v191_v2  ;;  %387 = vmatpush.msra.mxu3 %v192_v3 }
  0x13   : > { %221 = vmatpush.msra.mxu0 %v191_v2  ;;  %250 = vmatpush.msra.mxu1 %v192_v3 }
  0x14   : > { %384 = vmatpush.msra.mxu2 %v189_v4  ;;  %388 = vmatpush.msra.mxu3 %v190_v5 }
  0x15   : > { %222 = vmatpush.msra.mxu0 %v189_v4  ;;  %251 = vmatpush.msra.mxu1 %v190_v5 }
  0x16   : > { %385 = vmatpush.msra.mxu2 %v187_v6  ;;  %389 = vmatpush.msra.mxu3 %v188_v7 }
  0x17   : > { %372 = vmatmul.msk.f32.vlgmr.msra.gmra.mxu2 %vm195_vm0, %v185_v8  ;;  %376 = vmatmul.msk.f32.vlgmr.msra.gmra.mxu3 %vm195_vm0, %v185_v8 }
  0x18   : > { %223 = vmatpush.msra.mxu0 %v187_v6  ;;  %252 = vmatpush.msra.mxu1 %v188_v7 }
  0x19   : > { %370 = vmatmul.msk.f32.vlgmr.msra.gmra.mxu0 %vm195_vm0, %v183_v9  ;;  %374 = vmatmul.msk.f32.vlgmr.msra.gmra.mxu1 %vm195_vm0, %v183_v9 }
  0x1f   : > { %373 = vmatmul.msk.f32.gmra.mxu2 %vm195_vm0, %v186_v10  ;;  %377 = vmatmul.msk.f32.gmra.mxu3 %vm195_vm0, %v186_v10 }
  0x21   : > { %371 = vmatmul.msk.f32.gmra.mxu0 %vm195_vm0, %v184_v11  ;;  %375 = vmatmul.msk.f32.gmra.mxu1 %vm195_vm0, %v184_v11 }
  0x96   : > { %v225_v12 = vpop.f32.mrf.mxu0  ;;  %v254_v13 = vpop.f32.mrf.mxu1 }
  0x97   : > { %266 = vst [vmem:[%s181_s27] sm:$0xff] %v225_v12 }
  0x98   : > { %267 = vst [vmem:[%s181_s27 + $0x8] sm:$0xff] %v254_v13 }
  0x9a   : > { %v231_v14 = vpop.f32.mrf.mxu2  ;;  %v260_v15 = vpop.f32.mrf.mxu3 }
  0x9b   : > { %270 = vst [vmem:[%s181_s27 + $0x20] sm:$0xff] %v231_v14 }
  0x9c   : > { %271 = vst [vmem:[%s181_s27 + $0x28] sm:$0xff] %v260_v15 }
  0x9e   : > { %v228_v16 = vpop.f32.mrf.mxu0  ;;  %v257_v17 = vpop.f32.mrf.mxu1 }
  0x9f   : > { %268 = vst [vmem:[%s181_s27 + $0x10] sm:$0xff] %v228_v16 }
  0xa0   : > { %269 = vst [vmem:[%s181_s27 + $0x18] sm:$0xff] %v257_v17 }
  0xa2   : > { %v234_v18 = vpop.f32.mrf.mxu2  ;;  %v263_v19 = vpop.f32.mrf.mxu3 }
  0xa3   : > { %272 = vst [vmem:[%s181_s27 + $0x30] sm:$0xff] %v234_v18 }
  0xa4   : > { %273 = vst [vmem:[%s181_s27 + $0x38] sm:$0xff] %v263_v19 }
  0xa5 PF: > { %s12_s11 = sadd.s32 1, %s436_s11   ;;  %s516_s9 = smov %s432_s10 }
  0xa6   : > { %p9_p5 = scmp.ge.s32.totalorder %s12_s11, 4   ;;  %s517_s10 = smov %s519_s12 }
  0xa8   :  { %11 = sbr.rel (!%p9_p5) target bundleno = 2 (0x2), region = 58 }

</bundles_post_ra>
